<compile_context>
chip_gen: v7x
topology: tpu7x:2x2x1
jax: 0.10.0
libtpu: 0.0.40
codegen_flags: <defaults>
</compile_context>

<pallas_src>
import functools

import jax
import jax.numpy as jnp
from jax import lax
from jax.experimental import pallas as pl
from jax.experimental.pallas import tpu as pltpu

_MIB = 1024 * 1024


def _round_up(x, m):
    return (x + m - 1) // m * m


def _gelu_f32(x, approximate):
    if approximate == "tanh":
        # tanh-approx GELU: transcendental lands in the EUP slot (VALU relief).
        c = 0.7978845608028654  # sqrt(2/pi)
        return 0.5 * x * (1.0 + jnp.tanh(c * (x + 0.044715 * x * x * x)))
    # torch.nn.functional.gelu default: exact erf GELU.
    return 0.5 * x * (1.0 + lax.erf(x * 0.7071067811865476))


def _ff_kernel(x_ref, wa_ref, ba_ref, wg_ref, bg_ref, w2_ref, b2_ref,
               o_ref, acc_ref, *, approximate):
    # Grid: (row tiles i [parallel], hidden chunks k [arbitrary/reduction]).
    # x_ref : (tm, dim)                    native dtype (f32 or bf16)
    # wa_ref: (dim, tH), ba_ref: (1, tH)   value half of the first Linear
    # wg_ref: (dim, tH), bg_ref: (1, tH)   gate half of the first Linear
    # w2_ref: (tH, dim), b2_ref: (1, dim)  second Linear
    # acc_ref: (tm, dim) f32 accumulator scratch
    k = pl.program_id(1)

    @pl.when(k == 0)
    def _():
        acc_ref[...] = jnp.zeros_like(acc_ref)

    x = x_ref[...]

    # Gate half first (gelu immediately) -> shorter live range of f32 temps.
    g = jnp.dot(x, wg_ref[...], preferred_element_type=jnp.float32)
    g = _gelu_f32(g + bg_ref[...].astype(jnp.float32), approximate)

    a = jnp.dot(x, wa_ref[...], preferred_element_type=jnp.float32)
    u = (a + ba_ref[...].astype(jnp.float32)) * g

    # Second Linear: feed the MXU in the weights' native dtype, f32 accumulate.
    acc_ref[...] += jnp.dot(u.astype(w2_ref.dtype), w2_ref[...],
                            preferred_element_type=jnp.float32)

    @pl.when(k == pl.num_programs(1) - 1)
    def _():
        o_ref[...] = (acc_ref[...] + b2_ref[...].astype(jnp.float32)
                      ).astype(o_ref.dtype)


def _vmem_budget_bytes():
    """Per-generation VMEM budget with headroom for Mosaic internal scratch."""
    try:
        cap = int(pltpu.get_tpu_info().vmem_capacity_bytes)
    except Exception:  # pragma: no cover - conservative (v7x-sized) fallback
        cap = 64 * _MIB
    return max(int(cap * 0.8), 16 * _MIB)


def _vmem_needed(tm, th, dim, H, x_item, out_item, w_item, resident):
    need = 2 * tm * dim * x_item        # x row tile, double buffered
    need += 2 * tm * dim * out_item     # output row tile, double buffered
    need += tm * dim * 4                # f32 accumulator scratch
    need += 3 * tm * th * 4             # a / gelu(g) / u f32 intermediates
    if resident:
        # Whole W1/W2 + biases, SINGLE buffered (memory_space=VMEM binding).
        need += (3 * dim * H + 2 * H + dim) * w_item
    else:
        # Double-buffered (dim,tH)/(tH,dim) weight chunks + chunked biases.
        need += 2 * 3 * dim * th * w_item
        need += (2 * 2 * th + dim) * w_item
    return need


def _choose_tiles(M, dim, H, x_item, out_item, w_item, tm, th, budget, pack):
    if tm is None:
        # 128-MiB chips (v5e/v6e) -> 512 rows; 64-MiB v7x -> 256 rows.
        tm = 512 if budget >= 80 * _MIB else 256
    tm = max(pack, min(_round_up(tm, pack), _round_up(M, pack)))

    if th is not None:  # caller-forced hidden tile (lane dim -> 128-aligned)
        th = H if th >= H else max(128, _round_up(th, 128))
        return tm, th, th >= H

    tm_try = tm
    while True:
        # Preferred: all weights resident in VMEM (single copy).
        if _vmem_needed(tm_try, H, dim, H, x_item, out_item, w_item, True) <= budget:
            return tm_try, H, True
        # Otherwise stream the hidden dim in the largest 128-aligned chunk
        # that fits (power-of-two multiples of 128).
        th_try = 128
        while (th_try * 2 < H and
               _vmem_needed(tm_try, th_try * 2, dim, H, x_item, out_item,
                            w_item, False) <= budget):
            th_try *= 2
        if _vmem_needed(tm_try, th_try, dim, H, x_item, out_item, w_item,
                        False) <= budget:
            return tm_try, th_try, False
        if tm_try <= pack:
            return pack, 128, False  # best effort
        tm_try = max(pack, _round_up(tm_try // 2, pack))


def feed_forward_pallas(x, w1, b1, w2, b2, *, tm=None, th=None,
                        use_bf16_matmul=False, gelu_approximate="none"):
    """FeedForward forward pass.

    x : (B, N, dim)
    w1: (dim, 2H), b1: (2H,)   first Linear, stored (in_features, out_features)
    w2: (H, dim),  b2: (dim,)  second Linear
    """
    B, N, dim = x.shape
    H, dim_out = w2.shape
    assert dim_out == dim and w1.shape == (dim, 2 * H) and b1.shape == (2 * H,)
    assert b2.shape == (dim,)

    out_dtype = x.dtype
    M = B * N
    x2 = x.reshape(M, dim)

    # Optional bf16 MXU feed for an f32 model (f32xf32 matmul is multi-pass
    # on the MXU). Accumulation stays f32 and the epilogue/biases stay f32.
    if use_bf16_matmul and x2.dtype == jnp.float32:
        x2 = x2.astype(jnp.bfloat16)
        w1 = w1.astype(jnp.bfloat16)
        w2 = w2.astype(jnp.bfloat16)

    x_item = jnp.dtype(x2.dtype).itemsize
    w_item = jnp.dtype(w2.dtype).itemsize
    out_item = jnp.dtype(out_dtype).itemsize

    # Sublane pack of the activation dtype: 8 (f32), 16 (bf16), 32 (int8/fp8).
    pack = max(8, (8 * 4) // x_item)

    budget = _vmem_budget_bytes()
    tm_eff, th_eff, resident = _choose_tiles(
        M, dim, H, x_item, out_item, w_item, tm, th, budget, pack)

    # Row padding (zero rows -> garbage-free, sliced off at the end).
    M_pad = _round_up(max(M, tm_eff), tm_eff)
    if M_pad != M:
        x2 = jnp.pad(x2, ((0, M_pad - M), (0, 0)))

    # Split W1/b1 into GEGLU value / gate halves on the host (cheap XLA slice)
    # so the kernel never slices a (tm, 2H) intermediate along the lane dim.
    wa, wg = w1[:, :H], w1[:, H:]
    ba, bg = b1[:H].reshape(1, H), b1[H:].reshape(1, H)

    # Hidden padding: padded u columns hit zero rows of W2 -> contribute 0.
    H_pad = _round_up(H, th_eff)
    if H_pad != H:
        hp = H_pad - H
        wa = jnp.pad(wa, ((0, 0), (0, hp)))
        wg = jnp.pad(wg, ((0, 0), (0, hp)))
        ba = jnp.pad(ba, ((0, 0), (0, hp)))
        bg = jnp.pad(bg, ((0, 0), (0, hp)))
        w2 = jnp.pad(w2, ((0, hp), (0, 0)))
    b2_2 = b2.reshape(1, dim)

    n_m = M_pad // tm_eff
    n_k = H_pad // th_eff
    grid = (n_m, n_k)

    x_spec = pl.BlockSpec((tm_eff, dim), lambda i, k: (i, 0))
    out_spec = pl.BlockSpec((tm_eff, dim), lambda i, k: (i, 0))

    if resident:
        # Whole weights/biases live in VMEM for the entire grid, ONE copy
        # (no pipeline double-buffering) -> halves resident-weight VMEM.
        vmem_full = pl.BlockSpec(memory_space=pltpu.MemorySpace.VMEM)
        wa_spec = ba_spec = wg_spec = bg_spec = w2_spec = b2_spec = vmem_full
    else:
        # Stream H chunks; chunks are double-buffered to hide their DMA.
        wa_spec = pl.BlockSpec((dim, th_eff), lambda i, k: (0, k))
        ba_spec = pl.BlockSpec((1, th_eff), lambda i, k: (0, k))
        wg_spec = pl.BlockSpec((dim, th_eff), lambda i, k: (0, k))
        bg_spec = pl.BlockSpec((1, th_eff), lambda i, k: (0, k))
        w2_spec = pl.BlockSpec((th_eff, dim), lambda i, k: (k, 0))
        b2_spec = pl.BlockSpec(memory_space=pltpu.MemorySpace.VMEM)

    w_bytes = (3 * dim * H_pad + 2 * H_pad + dim) * w_item
    cost = pl.CostEstimate(
        flops=6 * M_pad * dim * H_pad,             # 2*M*d*2H + 2*M*H*d
        transcendentals=M_pad * H_pad,             # erf/tanh in the GELU
        bytes_accessed=(M_pad * dim * (x_item + out_item)
                        + w_bytes * (1 if resident else n_m)),
    )

    kernel = functools.partial(_ff_kernel, approximate=gelu_approximate)

    out = pl.pallas_call(
        kernel,
        out_shape=jax.ShapeDtypeStruct((M_pad, dim), out_dtype),
        grid_spec=pltpu.PrefetchScalarGridSpec(
            num_scalar_prefetch=0,
            grid=grid,
            in_specs=[x_spec, wa_spec, ba_spec, wg_spec, bg_spec,
                      w2_spec, b2_spec],
            out_specs=out_spec,
            scratch_shapes=[pltpu.VMEM((tm_eff, dim), jnp.float32)],
        ),
        compiler_params=pltpu.CompilerParams(
            # Token axis parallel (megacore); hidden axis is a reduction.
            dimension_semantics=("parallel", "arbitrary"),
            # Per-generation budget with headroom (not hardcoded 64 MiB).
            vmem_limit_bytes=int(budget),
        ),
        cost_estimate=cost,
    )(x2, wa, ba, wg, bg, w2, b2_2)

    if M_pad != M:
        out = out[:M]
    return out.reshape(B, N, dim)


def feed_forward_ref(x, w1, b1, w2, b2, gelu_approximate="none"):
    """Pure-JAX f32 reference matching the PyTorch FeedForward forward."""
    xf = x.astype(jnp.float32)
    h = jnp.einsum("bnd,dk->bnk", xf, w1.astype(jnp.float32)) + b1.astype(jnp.float32)
    H = w2.shape[0]
    a, g = h[..., :H], h[..., H:]
    u = a * _gelu_f32(g, gelu_approximate)
    y = jnp.einsum("bnh,hd->bnd", u, w2.astype(jnp.float32)) + b2.astype(jnp.float32)
    return y.astype(x.dtype)


def _make_params(key, dim, H, dtype=jnp.float32):
    k1, k2, k3, k4 = jax.random.split(key, 4)
    lim1 = dim ** -0.5
    w1 = jax.random.uniform(k1, (dim, 2 * H), jnp.float32, -lim1, lim1).astype(dtype)
    b1 = jax.random.uniform(k2, (2 * H,), jnp.float32, -lim1, lim1).astype(dtype)
    lim2 = H ** -0.5
    w2 = jax.random.uniform(k3, (H, dim), jnp.float32, -lim2, lim2).astype(dtype)
    b2 = jax.random.uniform(k4, (dim,), jnp.float32, -lim2, lim2).astype(dtype)
    return w1, b1, w2, b2


if __name__ == "__main__":
    key = jax.random.PRNGKey(0)
    k0, k1, k2, k3 = jax.random.split(key, 4)

    # --- Test 1: FeedForward(dim=16, mult=4), f32, B=2, N=8 (resident path) --
    B, N, dim, mult = 2, 8, 16, 4
    H = dim * mult
    x = jax.random.normal(k0, (B, N, dim), jnp.float32)
    w1, b1, w2, b2 = _make_params(k1, dim, H)
    y = jax.block_until_ready(feed_forward_pallas(x, w1, b1, w2, b2))
    y_ref = feed_forward_ref(x, w1, b1, w2, b2)
    assert y.shape == (B, N, dim)
    assert jnp.allclose(y, y_ref, atol=2e-5, rtol=2e-5), "f32 mismatch vs reference"

    # --- Test 2: token count not a tile multiple (padding, grid > 1) --------
    B2, N2, dim2, mult2 = 3, 40, 32, 4                  # M = 120
    H2 = dim2 * mult2
    xb = jax.random.normal(k2, (B2, N2, dim2), jnp.float32)
    w1b, b1b, w2b, b2b = _make_params(k3, dim2, H2)
    y2 = jax.block_until_ready(
        feed_forward_pallas(xb, w1b, b1b, w2b, b2b, tm=48))   # 3 row tiles
    y2_ref = feed_forward_ref(xb, w1b, b1b, w2b, b2b)
    assert jnp.allclose(y2, y2_ref, atol=1e-4, rtol=1e-4), "padded-M mismatch"

    # --- Test 3: bf16 path (native-dtype MXU, 16-row sublane pack) ----------
    xbf = xb.astype(jnp.bfloat16)
    y3 = jax.block_until_ready(feed_forward_pallas(
        xbf, w1b.astype(jnp.bfloat16), b1b.astype(jnp.bfloat16),
        w2b.astype(jnp.bfloat16), b2b.astype(jnp.bfloat16), tm=48))
    y3_ref = feed_forward_ref(xbf, w1b.astype(jnp.bfloat16), b1b.astype(jnp.bfloat16),
                              w2b.astype(jnp.bfloat16), b2b.astype(jnp.bfloat16))
    assert y3.dtype == jnp.bfloat16 and y3.shape == (B2, N2, dim2)
    assert jnp.allclose(y3.astype(jnp.float32), y3_ref.astype(jnp.float32),
                        atol=5e-2, rtol=5e-2), "bf16 mismatch vs reference"

    # --- Test 4: forced hidden-dim chunking (H=256, tH=128 -> 2-step k axis) -
    B4, N4, dim4 = 2, 64, 64
    H4 = dim4 * 4                                        # 256
    x4 = jax.random.normal(jax.random.fold_in(key, 4), (B4, N4, dim4), jnp.float32)
    w14, b14, w24, b24 = _make_params(jax.random.fold_in(key, 5), dim4, H4)
    y4 = jax.block_until_ready(
        feed_forward_pallas(x4, w14, b14, w24, b24, tm=64, th=128))
    y4_ref = feed_forward_ref(x4, w14, b14, w24, b24)
    assert jnp.allclose(y4, y4_ref, atol=1e-4, rtol=1e-4), "H-chunked mismatch"

    # --- Test 5: f32 model fed to the MXU in bf16 (f32 accum + f32 epilogue) -
    y5 = jax.block_until_ready(
        feed_forward_pallas(xb, w1b, b1b, w2b, b2b, use_bf16_matmul=True))
    assert y5.dtype == jnp.float32
    assert jnp.allclose(y5, y2_ref, atol=5e-2, rtol=5e-2), "bf16-matmul mismatch"

    # --- Test 6: tanh-approx GELU (EUP slot) vs matching reference ----------
    y6 = jax.block_until_ready(
        feed_forward_pallas(xb, w1b, b1b, w2b, b2b, gelu_approximate="tanh"))
    y6_ref = feed_forward_ref(xb, w1b, b1b, w2b, b2b, gelu_approximate="tanh")
    assert jnp.allclose(y6, y6_ref, atol=1e-3, rtol=1e-3), "tanh-GELU mismatch"

    print("KERNEL_OK")
</pallas_src>

<mosaic_0001>
module attributes {stable_mosaic.version = 11 : i64} {
  func.func @_ff_kernel(%arg0: i32, %arg1: i32, %arg2: memref<16x16xf32, #tpu.memory_space<vmem>>, %arg3: memref<16x64xf32, #tpu.memory_space<vmem>>, %arg4: memref<1x64xf32, #tpu.memory_space<vmem>>, %arg5: memref<16x64xf32, #tpu.memory_space<vmem>>, %arg6: memref<1x64xf32, #tpu.memory_space<vmem>>, %arg7: memref<64x16xf32, #tpu.memory_space<vmem>>, %arg8: memref<1x16xf32, #tpu.memory_space<vmem>>, %arg9: memref<16x16xf32, #tpu.memory_space<vmem>>, %arg10: memref<16x16xf32, #tpu.memory_space<vmem>>) attributes {dimension_semantics = [#tpu.dimension_semantics<parallel>, #tpu.dimension_semantics<arbitrary>], iteration_bounds = array<i64: 1, 1>, scalar_prefetch = 0 : i64, scratch_operands = 1 : i64, tpu.core_type = #tpu.core_type<tc>, window_params = [{transform_indices = @transform_0, window_bounds = array<i64: 16, 16>}, {pipeline_mode = #tpu.pipeline_mode<synchronous>, transform_indices = @transform_1, window_bounds = array<i64: 16, 64>}, {pipeline_mode = #tpu.pipeline_mode<synchronous>, transform_indices = @transform_2, window_bounds = array<i64: 1, 64>}, {pipeline_mode = #tpu.pipeline_mode<synchronous>, transform_indices = @transform_3, window_bounds = array<i64: 16, 64>}, {pipeline_mode = #tpu.pipeline_mode<synchronous>, transform_indices = @transform_4, window_bounds = array<i64: 1, 64>}, {pipeline_mode = #tpu.pipeline_mode<synchronous>, transform_indices = @transform_5, window_bounds = array<i64: 64, 16>}, {pipeline_mode = #tpu.pipeline_mode<synchronous>, transform_indices = @transform_6, window_bounds = array<i64: 1, 16>}, {transform_indices = @transform_7, window_bounds = array<i64: 16, 16>}]} {
    %c0_i32 = arith.constant 0 : i32
    %0 = arith.cmpi eq, %arg1, %c0_i32 : i32
    %1 = arith.extui %0 : i1 to i32
    %c0_i32_0 = arith.constant 0 : i32
    %2 = arith.cmpi ne, %1, %c0_i32_0 : i32
    scf.if %2 {
      %cst_23 = arith.constant 0.000000e+00 : f32
      %31 = vector.broadcast %cst_23 : f32 to vector<16x16xf32>
      %c0_24 = arith.constant 0 : index
      %c0_25 = arith.constant 0 : index
      %32 = vector.load %arg10[%c0_24, %c0_25] : memref<16x16xf32, #tpu.memory_space<vmem>>, vector<16x16xf32>
      tpu.vector_store %arg10[%c0_24, %c0_25], %31 {strides = array<i32>} : memref<16x16xf32, #tpu.memory_space<vmem>>, vector<16x16xf32>,
    } else {
    }
    %c0 = arith.constant 0 : index
    %c0_1 = arith.constant 0 : index
    %3 = vector.load %arg2[%c0, %c0_1] : memref<16x16xf32, #tpu.memory_space<vmem>>, vector<16x16xf32>
    %c0_2 = arith.constant 0 : index
    %c0_3 = arith.constant 0 : index
    %4 = vector.load %arg5[%c0_2, %c0_3] : memref<16x64xf32, #tpu.memory_space<vmem>>, vector<16x64xf32>
    %cst = arith.constant dense<0.000000e+00> : vector<16x64xf32>
    %5 = tpu.matmul %3, %4, %cst {dimension_numbers = #tpu.dot_dimension_numbers<[1], [0], [0], [1], [0, 0, 1, 1], [], []>} : vector<16x16xf32>, vector<16x64xf32>, vector<16x64xf32> -> vector<16x64xf32>
    %c0_4 = arith.constant 0 : index
    %c0_5 = arith.constant 0 : index
    %6 = vector.load %arg6[%c0_4, %c0_5] : memref<1x64xf32, #tpu.memory_space<vmem>>, vector<1x64xf32>
    %7 = vector.broadcast %6 : vector<1x64xf32> to vector<16x64xf32>
    %8 = arith.addf %5, %7 : vector<16x64xf32>
    %cst_6 = arith.constant 5.000000e-01 : f32
    %9 = vector.broadcast %cst_6 : f32 to vector<16x64xf32>
    %10 = arith.mulf %9, %8 : vector<16x64xf32>
    %cst_7 = arith.constant 0.707106769 : f32
    %11 = vector.broadcast %cst_7 : f32 to vector<16x64xf32>
    %12 = arith.mulf %8, %11 : vector<16x64xf32>
    %13 = math.erf %12 : vector<16x64xf32>
    %cst_8 = arith.constant 1.000000e+00 : f32
    %14 = vector.broadcast %cst_8 : f32 to vector<16x64xf32>
    %15 = arith.addf %14, %13 : vector<16x64xf32>
    %16 = arith.mulf %10, %15 : vector<16x64xf32>
    %c0_9 = arith.constant 0 : index
    %c0_10 = arith.constant 0 : index
    %17 = vector.load %arg3[%c0_9, %c0_10] : memref<16x64xf32, #tpu.memory_space<vmem>>, vector<16x64xf32>
    %cst_11 = arith.constant dense<0.000000e+00> : vector<16x64xf32>
    %18 = tpu.matmul %3, %17, %cst_11 {dimension_numbers = #tpu.dot_dimension_numbers<[1], [0], [0], [1], [0, 0, 1, 1], [], []>} : vector<16x16xf32>, vector<16x64xf32>, vector<16x64xf32> -> vector<16x64xf32>
    %c0_12 = arith.constant 0 : index
    %c0_13 = arith.constant 0 : index
    %19 = vector.load %arg4[%c0_12, %c0_13] : memref<1x64xf32, #tpu.memory_space<vmem>>, vector<1x64xf32>
    %20 = vector.broadcast %19 : vector<1x64xf32> to vector<16x64xf32>
    %21 = arith.addf %18, %20 : vector<16x64xf32>
    %22 = arith.mulf %21, %16 : vector<16x64xf32>
    %c0_14 = arith.constant 0 : index
    %c0_15 = arith.constant 0 : index
    %23 = vector.load %arg10[%c0_14, %c0_15] : memref<16x16xf32, #tpu.memory_space<vmem>>, vector<16x16xf32>
    %c0_16 = arith.constant 0 : index
    %c0_17 = arith.constant 0 : index
    %24 = vector.load %arg7[%c0_16, %c0_17] : memref<64x16xf32, #tpu.memory_space<vmem>>, vector<64x16xf32>
    %cst_18 = arith.constant dense<0.000000e+00> : vector<16x16xf32>
    %25 = tpu.matmul %22, %24, %cst_18 {dimension_numbers = #tpu.dot_dimension_numbers<[1], [0], [0], [1], [0, 0, 1, 1], [], []>} : vector<16x64xf32>, vector<64x16xf32>, vector<16x16xf32> -> vector<16x16xf32>
    %26 = arith.addf %23, %25 : vector<16x16xf32>
    %c0_19 = arith.constant 0 : index
    %c0_20 = arith.constant 0 : index
    %27 = vector.load %arg10[%c0_19, %c0_20] : memref<16x16xf32, #tpu.memory_space<vmem>>, vector<16x16xf32>
    tpu.vector_store %arg10[%c0_19, %c0_20], %26 {strides = array<i32>} : memref<16x16xf32, #tpu.memory_space<vmem>>, vector<16x16xf32>,
    %c0_i32_21 = arith.constant 0 : i32
    %28 = arith.cmpi eq, %arg1, %c0_i32_21 : i32
    %29 = arith.extui %28 : i1 to i32
    %c0_i32_22 = arith.constant 0 : i32
    %30 = arith.cmpi ne, %29, %c0_i32_22 : i32
    scf.if %30 {
      %c0_23 = arith.constant 0 : index
      %c0_24 = arith.constant 0 : index
      %31 = vector.load %arg10[%c0_23, %c0_24] : memref<16x16xf32, #tpu.memory_space<vmem>>, vector<16x16xf32>
      %c0_25 = arith.constant 0 : index
      %c0_26 = arith.constant 0 : index
      %32 = vector.load %arg8[%c0_25, %c0_26] : memref<1x16xf32, #tpu.memory_space<vmem>>, vector<1x16xf32>
      %33 = vector.broadcast %32 : vector<1x16xf32> to vector<16x16xf32>
      %34 = arith.addf %31, %33 : vector<16x16xf32>
      %c0_27 = arith.constant 0 : index
      %c0_28 = arith.constant 0 : index
      %35 = vector.load %arg9[%c0_27, %c0_28] : memref<16x16xf32, #tpu.memory_space<vmem>>, vector<16x16xf32>
      tpu.vector_store %arg9[%c0_27, %c0_28], %34 {strides = array<i32>} : memref<16x16xf32, #tpu.memory_space<vmem>>, vector<16x16xf32>,
    } else {
    }
    return
  }
  func.func @transform_0(%arg0: i32, %arg1: i32) -> (i32, i32) {
    %c0_i32 = arith.constant 0 : i32
    %c0_i32_0 = arith.constant 0 : i32
    return %arg0, %c0_i32 : i32, i32
  }
  func.func @transform_1(%arg0: i32, %arg1: i32) -> (i32, i32) {
    %c0_i32 = arith.constant 0 : i32
    %c0_i32_0 = arith.constant 0 : i32
    %c0_i32_1 = arith.constant 0 : i32
    return %c0_i32, %c0_i32_0 : i32, i32
  }
  func.func @transform_2(%arg0: i32, %arg1: i32) -> (i32, i32) {
    %c0_i32 = arith.constant 0 : i32
    %c0_i32_0 = arith.constant 0 : i32
    %c0_i32_1 = arith.constant 0 : i32
    return %c0_i32, %c0_i32_0 : i32, i32
  }
  func.func @transform_3(%arg0: i32, %arg1: i32) -> (i32, i32) {
    %c0_i32 = arith.constant 0 : i32
    %c0_i32_0 = arith.constant 0 : i32
    %c0_i32_1 = arith.constant 0 : i32
    return %c0_i32, %c0_i32_0 : i32, i32
  }
  func.func @transform_4(%arg0: i32, %arg1: i32) -> (i32, i32) {
    %c0_i32 = arith.constant 0 : i32
    %c0_i32_0 = arith.constant 0 : i32
    %c0_i32_1 = arith.constant 0 : i32
    return %c0_i32, %c0_i32_0 : i32, i32
  }
  func.func @transform_5(%arg0: i32, %arg1: i32) -> (i32, i32) {
    %c0_i32 = arith.constant 0 : i32
    %c0_i32_0 = arith.constant 0 : i32
    %c0_i32_1 = arith.constant 0 : i32
    return %c0_i32, %c0_i32_0 : i32, i32
  }
  func.func @transform_6(%arg0: i32, %arg1: i32) -> (i32, i32) {
    %c0_i32 = arith.constant 0 : i32
    %c0_i32_0 = arith.constant 0 : i32
    %c0_i32_1 = arith.constant 0 : i32
    return %c0_i32, %c0_i32_0 : i32, i32
  }
  func.func @transform_7(%arg0: i32, %arg1: i32) -> (i32, i32) {
    %c0_i32 = arith.constant 0 : i32
    %c0_i32_0 = arith.constant 0 : i32
    return %arg0, %c0_i32 : i32, i32
  }
}

</mosaic_0001>

<bundles_post_ra>
// kernel: tpu_custom_call.1
= control target key start
LH: loop header
LB: loop body
LE: loop exit
PB: predicated region body
PF: predicated region fallthrough
CT: control target
= control target key end

     0   :  { %vm31_vm0 = vcmask 130048   ;;  %s584_s0 = inlined_call_operand.vmem [shape: f32[16,16], index: 0, kind: input, shape index: {}]   ;;  %s585_s1 = inlined_call_operand.vmem [shape: f32[16,64], index: 1, kind: input, shape index: {}]   ;;  %s586_s2 = inlined_call_operand.vmem [shape: f32[1,64], index: 2, kind: input, shape index: {}]   ;;  %s587_s3 = inlined_call_operand.vmem [shape: f32[16,64], index: 3, kind: input, shape index: {}]   ;;  %s588_s4 = inlined_call_operand.vmem [shape: f32[1,64], index: 4, kind: input, shape index: {}]   ;;  %s589_s5 = inlined_call_operand.vmem [shape: f32[64,16], index: 5, kind: input, shape index: {}]   ;;  %s590_s6 = inlined_call_operand.vmem [shape: f32[1,16], index: 6, kind: input, shape index: {}]   ;;  %s591_s7 = inlined_call_operand.hbm [shape: f32[16,16], index: 7, kind: output, shape index: {}]  }
   0x1   :  { %v36_v0 = vld [vmem:[%s587_s3] sm:$0xff]  ;;  %v37_v1 = vld [vmem:[%s587_s3 + $0x8] sm:$0xff] }
   0x2   :  { %v34_v2 = vld [vmem:[%s584_s0] sm:$0xff]  ;;  %v411_v3 = vpack.c.bf16 %v37_v1, %v36_v0  ;;  %v138_v5 = vld [vmem:[%s585_s1 + $0x8] sm:$0xff] }
   0x3   :  { %382 = vmatprep.mubr.msk.f32.mxu1 %vm31_vm0, %v34_v2  ;;  %v137_v4 = vld [vmem:[%s585_s1] sm:$0xff] }
   0x4   :  { %v415_v6 = vpack.c.bf16 %v138_v5, %v137_v4 }
   0x5   :  { %12 = vsyncpa [#allocation4], 0  ;;  %412 = vmatprep.subr.bf16.mxu1 %v411_v3  ;;  %v35_v7 = vld [vmem:[%s584_s0 + $0x8] sm:$0xff]  ;;  %v225_v8 = vld [vmem:[%s589_s5] sm:$0xff]  ;;  %v467_v20 = vmov 0.0   ;;  %vm233_vm1 = vcmask 523264  }
   0x6   :  { %414 = vmatpush3.bf16.msra.mxu1 %v411_v3  ;;  %v226_v9 = vld [vmem:[%s589_s5 + $0x8] sm:$0xff]  ;;  %v227_v11 = vld [vmem:[%s589_s5 + $0x10] sm:$0xff]  ;;  %v228_v12 = vld [vmem:[%s589_s5 + $0x18] sm:$0xff]  ;;  %33 = vst.msk [vmem:[#allocation2 + $0x8] sm:$0xff] %vm31_vm0, %v467_v20  ;;  %s468_s29 = smov [#allocation3]  }
   0x7   :  { %416 = vmatprep.subr.bf16.mxu1 %v415_v6  ;;  %v419_v10 = vpack.c.bf16 %v226_v9, %v225_v8  ;;  %v423_v13 = vpack.c.bf16 %v228_v12, %v227_v11  ;;  %v229_v14 = vld [vmem:[%s589_s5 + $0x20] sm:$0xff]  ;;  %v230_v15 = vld [vmem:[%s589_s5 + $0x28] sm:$0xff]  ;;  %v231_v17 = vld [vmem:[%s589_s5 + $0x30] sm:$0xff]  ;;  %32 = vst.msk [vmem:[#allocation2] sm:$0xff] %vm31_vm0, %v467_v20  ;;  %s340_s30 = sshll.u32 %s468_s29, 4  ;;  %s341_s30 = int_to_ptr.vmem [resolvable:$true] %s340_s30 }
   0x8   :  { %v427_v16 = vpack.c.bf16 %v230_v15, %v229_v14  ;;  %v232_v18 = vld [vmem:[%s589_s5 + $0x38] sm:$0xff]  ;;  %v351_v21 = vld [vmem:[%s588_s4] ss:$0 sm:$0xff]  ;;  %s443_s8 = scalar_lea.vmem %s341_s30, 256  ;;  %p448_p1 = scmp.lt.s32.totalorder %s341_s30, %s341_s30 }
   0x9   :  { %383 = vmatmul.mubr.msk.f32.vlgmr.msra.gmra.mrb[0].mxu1 %vm31_vm0, %v35_v7  ;;  %420 = vmatprep.subr.bf16.mxu0 %v419_v10  ;;  %v431_v19 = vpack.c.bf16 %v232_v18, %v231_v17  ;;  %v354_v30 = vld [vmem:[%s586_s2] ss:$0 sm:$0xff]  ;;  %p444_p0 = scmp.ne.s32.totalorder %s341_s30, %s443_s8  ;;  %p449_p2 = scmp.lt.s32.totalorder %s443_s8, %s443_s8 }
   0xa   :  { %418 = vmatpush3.bf16.msra.mxu1 %v415_v6  ;;  %389 = vmatprep.mubr.msk.f32.mxu1 %vm31_vm0, %v34_v2  ;;  %v359_v49 = vld [vmem:[%s590_s6] ss:$0 sm:$0xff] }
   0xb   :  { %422 = vmatpush3.bf16.msra.mxu0 %v419_v10  ;;  %p450_p3 = por %p449_p2, %p448_p1 }
   0xc   :  { %424 = vmatprep.subr.bf16.mxu0 %v423_v13 }
   0xd   :  { %390 = vmatmul.mubr.msk.f32.vlgmr.msra.gmra.mrb[2].mxu1 %vm31_vm0, %v35_v7  ;;  %v224_v43 = vld [vmem:[#allocation2 + $0x8] sm:$0xff]  ;;  %p451_p4 = pnand %p450_p3, %p444_p0 }
   0xe   :  { %v223_v44 = vld [vmem:[#allocation2] sm:$0xff] }
   0xf   :  { %426 = vmatpush3.bf16.msra.mxu0 %v423_v13 }
  0x10   :  { %428 = vmatprep.subr.bf16.mxu0 %v427_v16 }
  0x13   :  { %430 = vmatpush3.bf16.msra.mxu0 %v427_v16 }
  0x14   :  { %432 = vmatprep.subr.bf16.mxu0 %v431_v19 }
  0x17   :  { %434 = vmatpush3.bf16.msra.mxu0 %v431_v19 }
  0xdc   :  { %v384_v22 = vpop.f32.mrb[0].mxu1 }
  0xdd   :  { %v124_v23 = vadd.f32 %v384_v22, %v351_v21  ;;  %v118_v24 = vpop.f32.mrb[1].mxu1 }
  0xde   :  { %v119_v25 = vadd.f32 %v351_v21, %v118_v24 }
  0xdf   :  { %v130_v26 = vmul.f32 0.70710677, %v124_v23  ;;  %v128_v33 = vmul.f32 0.5, %v124_v23 }
  0xe0   :  { %v129_v27 = vmul.f32 0.70710677, %v119_v25  ;;  %v391_v28 = vpop.f32.mrb[2].mxu1  ;;  %v127_v36 = vmul.f32 0.5, %v119_v25 }
  0xe1   :  { %439 = verf.f32 %v130_v26  ;;  %v212_v29 = vpop.f32.mrb[3].mxu1  ;;  %v218_v35 = vadd.f32 %v391_v28, %v354_v30 }
  0xe2   :  { %441 = verf.f32 %v129_v27  ;;  %v213_v37 = vadd.f32 %v354_v30, %v212_v29 }
  0xeb   :  { %v440_v31 = vpop.eup %439 }
  0xec   :  { %v442_v32 = vpop.eup %441  ;;  %v134_v34 = vadd.f32 1.0, %v440_v31 }
  0xed   :  { %v133_v38 = vadd.f32 1.0, %v442_v32 }
  0xee   :  { %v136_v39 = vmul.f32 %v134_v34, %v128_v33 }
  0xef   :  { %v135_v40 = vmul.f32 %v133_v38, %v127_v36 }
  0xf0   :  { %v222_v41 = vmul.f32 %v218_v35, %v136_v39 }
  0xf1   :  { %v221_v42 = vmul.f32 %v213_v37, %v135_v40 }
  0xf3   :  { %408 = vmatprep.mubr.msk.f32.mxu0 %vm233_vm1, %v221_v42 }
  0xf4   :  { %409 = vmatmul.mubr.msk.f32.vlgmr.msra.gmra.mrb[0].mxu0 %vm233_vm1, %v222_v41 }
 0x1c7   :  { %v410_v45 = vpop.f32.mrb[0].mxu0 }
 0x1c8   :  { %v316_v46 = vadd.f32 %v410_v45, %v224_v43  ;;  %v306_v47 = vpop.f32.mrb[1].mxu0 }
 0x1c9   :  { %v315_v48 = vadd.f32 %v306_v47, %v223_v44 }
 0x1ca   :  { %318 = vst.msk [vmem:[#allocation2 + $0x8] sm:$0xff] %vm31_vm0, %v316_v46 }
 0x1cb   :  { %317 = vst.msk [vmem:[#allocation2] sm:$0xff] %vm31_vm0, %v315_v48 }
 0x1d1   :  { %v323_v50 = vld [vmem:[#allocation2 + $0x8] sm:$0xff] }
 0x1d2   :  { %v322_v51 = vld [vmem:[#allocation2] sm:$0xff]  ;;  %v332_v52 = vadd.f32 %v359_v49, %v323_v50 }
 0x1d3   :  { %v331_v53 = vadd.f32 %v359_v49, %v322_v51 }
 0x1d4   :  { %334 = vst.msk [vmem:[#allocation3 + $0x8] sm:$0xff] %vm31_vm0, %v332_v52 }
 0x1d5   :  { %333 = vst.msk [vmem:[#allocation3] sm:$0xff] %vm31_vm0, %v331_v53 }
 0x1d6   :  { %454 = shalt.err (!%p451_p4)
}
 0x1d7   :  { %s455_s10 = scalar_lea.hbm %s591_s7, 256 }
 0x1d8   :  { %p456_p5 = scmp.ne.s32.totalorder %s591_s7, %s455_s10  ;;  %p459_p6 = scmp.lt.u32.totalorder %s455_s10, %s591_s7 }
 0x1da   :  { %p461_p7 = pnand %p459_p6, %p456_p5 }
 0x1dc   :  { %464 = shalt.err (!%p461_p7)
}
 0x1dd   :  { %s469_s1 = smov 128   ;;  %s470_s14 = smov 8  }
 0x1de   :  { %346 = dma.vmem_to_hbm [thread:$0]  %s341_s30, 256, %s591_s7, [#allocation4], %s469_s1, %s469_s1, %s470_s14  }
 0x1df   :  { %465 = dma.done.wait [#allocation4], 256  }
 0x1e0   :  { %466 = vsyncadd [#allocation4], 4294967040 }
 0x1e1   :  { %350 = vsyncpa [#allocation4], 1 }

</bundles_post_ra>
